<compile_context>
chip_gen: v7x
topology: tpu7x:2x2x1
jax: 0.10.0
libtpu: 0.0.40
codegen_flags: <defaults>
</compile_context>

<pallas_src>
import jax
import jax.numpy as jnp
import numpy as np
from jax.experimental import pallas as pl
from jax.experimental.pallas import tpu as pltpu


def _round_up(v, m):
    return ((v + m - 1) // m) * m


def _choose_row_tile(n, d, k_pad, x_bytes, q_bytes, e_bytes, budget_bytes):
    """Pick a row tile that keeps double-buffered tiles + intermediates in budget."""
    # Per-row: double-buffered x and q tiles, f32 (TN,K) score, one-hot in the
    # codebook dtype, double-buffered idx lane, f32 x upcast.
    per_row = (2 * d * x_bytes + 2 * d * q_bytes + 4 * d
               + 4 * k_pad + e_bytes * k_pad + 2 * 4)
    # Resident codebook + e2 (count twice: the pipeline allocates two buffers
    # even for constant index maps).
    fixed = 2 * (k_pad * d * e_bytes + k_pad * 4)
    avail = max(budget_bytes - fixed, 8 * per_row)
    tile = int(avail // per_row)
    tile = max(8, min(tile, 1024))
    if tile >= 128:
        tile = (tile // 128) * 128   # keep large tiles lane-aligned
    else:
        tile = (tile // 8) * 8
    return tile


def _vq_kernel(x_ref, e_ref, e2h_ref, q_ref, idx_ref):
    """One tile of rows: nearest-codebook-entry search + gather-via-onehot.

    x_ref:   (TN, D)        input rows (native dtype)
    e_ref:   (Kp, D)        full (K-padded) codebook, resident
    e2h_ref: (1,  Kp) f32   precomputed 0.5*||e||^2 (padded codes = 1e30)
    q_ref:   (TN, D)        quantized rows (output, x.dtype)
    idx_ref: (1, 1, TN)     argmax code indices (output, int32, lane-dense)
    """
    x = x_ref[...].astype(jnp.float32)          # (TN, D)
    e = e_ref[...]                              # (Kp, D) native dtype
    tn = x_ref.shape[0]
    kp = e_ref.shape[0]

    # Distance matmul kept in f32 so the argmax matches the f32 reference.
    xe = jax.lax.dot_general(
        x, e.astype(jnp.float32),
        dimension_numbers=(((1,), (1,)), ((), ())),
        preferred_element_type=jnp.float32)     # (TN, Kp) on the MXU

    # argmax(-(||x||^2 - 2 xE^T + ||e||^2)) == argmax(xE^T - 0.5||e||^2).
    score = xe - e2h_ref[...]                   # (TN, Kp), single VPU sub

    idx = jnp.argmax(score, axis=-1).astype(jnp.int32)       # (TN,)

    # F.embedding gather as one-hot @ codebook (MXU). One-hot values are exact
    # in the codebook dtype (incl. bf16), so the result is a bit-exact row copy.
    onehot = (jax.lax.broadcasted_iota(jnp.int32, (tn, kp), 1) == idx[:, None])
    quant = jnp.dot(onehot.astype(e.dtype), e,
                    preferred_element_type=jnp.float32)       # (TN, D)

    q_ref[...] = quant.astype(q_ref.dtype)
    idx_ref[...] = idx[None, None, :]


def euclidean_codebook_forward(x, embed, *, row_tile=None,
                               vmem_limit_bytes=32 * 1024 * 1024):
    """Eval-mode EuclideanCodebook.forward. Returns (quantize, embed_ind, perplexity).

    x:     (..., D) float32 / bfloat16
    embed: (K, D)   codebook
    """
    *lead, d = x.shape
    k = embed.shape[0]
    flatten = x.reshape(-1, d)                  # native dtype, no upcast
    n = flatten.shape[0]

    # --- codebook prep (done once, tiny) -----------------------------------
    # Pad K to a lane-aligned multiple of 128; padded codes get a huge norm so
    # they can never win the argmax, and zero rows so a (never-taken) gather of
    # them would be harmless.
    k_pad = _round_up(max(k, 128), 128)
    embed_p = embed if k_pad == k else jnp.pad(embed, ((0, k_pad - k), (0, 0)))
    e2h = 0.5 * jnp.sum(embed.astype(jnp.float32) ** 2, axis=1)    # (K,)
    if k_pad != k:
        e2h = jnp.concatenate(
            [e2h, jnp.full((k_pad - k,), 1e30, dtype=jnp.float32)])
    e2h = e2h.reshape(1, k_pad)

    # --- row tiling ---------------------------------------------------------
    if row_tile is None:
        row_tile = _choose_row_tile(
            n, d, k_pad,
            x_bytes=flatten.dtype.itemsize,
            q_bytes=flatten.dtype.itemsize,
            e_bytes=embed_p.dtype.itemsize,
            budget_bytes=int(0.5 * vmem_limit_bytes))
    row_tile = max(8, _round_up(min(row_tile, _round_up(n, 8)), 8))

    n_pad = _round_up(n, row_tile)
    if n_pad != n:
        flatten = jnp.pad(flatten, ((0, n_pad - n), (0, 0)))
    num_tiles = n_pad // row_tile

    quant_flat, idx_tiles = pl.pallas_call(
        _vq_kernel,
        out_shape=(
            jax.ShapeDtypeStruct((n_pad, d), x.dtype),
            jax.ShapeDtypeStruct((num_tiles, 1, row_tile), jnp.int32),
        ),
        grid_spec=pltpu.PrefetchScalarGridSpec(
            num_scalar_prefetch=0,
            grid=(num_tiles,),
            in_specs=[
                pl.BlockSpec((row_tile, d), lambda i: (i, 0)),   # streamed rows
                pl.BlockSpec((k_pad, d), lambda i: (0, 0)),      # resident codebook
                pl.BlockSpec((1, k_pad), lambda i: (0, 0)),      # resident 0.5||e||^2
            ],
            out_specs=[
                pl.BlockSpec((row_tile, d), lambda i: (i, 0)),
                pl.BlockSpec((1, 1, row_tile), lambda i: (i, 0, 0)),  # lane-dense idx
            ],
        ),
        compiler_params=pltpu.CompilerParams(
            dimension_semantics=("parallel",),       # shards rows across v7x's 2 TCs
            vmem_limit_bytes=vmem_limit_bytes),
    )(flatten, embed_p, e2h)

    idx_flat = idx_tiles.reshape(-1)[:n]
    quantize = quant_flat[:n].reshape(x.shape)
    embed_ind = idx_flat.reshape(tuple(lead))

    # Side products (perplexity) without materializing the (N, K) one-hot:
    # a K-length bincount is all that is needed; math in f32.
    counts = jnp.bincount(idx_flat, length=k).astype(jnp.float32)
    avg_probs = counts / jnp.float32(n)
    perplexity = jnp.exp(-jnp.sum(avg_probs * jnp.log(avg_probs + 1e-10)))

    return quantize, embed_ind, perplexity


def _reference_forward(x, embed):
    """Pure-JAX reference matching the PyTorch eval forward."""
    *lead, d = x.shape
    flatten = x.reshape(-1, d).astype(jnp.float32)
    e = embed.astype(jnp.float32)
    dist = -(jnp.sum(flatten**2, axis=1, keepdims=True)
             - 2.0 * flatten @ e.T
             + jnp.sum(e**2, axis=1)[None, :])
    idx = jnp.argmax(dist, axis=-1)
    quant = embed[idx].reshape(x.shape)
    return quant, idx.reshape(tuple(lead))


if __name__ == "__main__":
    key = jax.random.PRNGKey(0)
    k_x, k_e = jax.random.split(key)

    dim = 32            # codebook feature dim
    codebook_size = 64  # number of codes
    batch, seq = 2, 8   # leading dims of x: x is (B, T, D)

    x = jax.random.normal(k_x, (batch, seq, dim), dtype=jnp.float32)
    # Deterministic stand-in for torch.randn(codebook_size, dim).
    embed = jax.random.normal(k_e, (codebook_size, dim), dtype=jnp.float32)

    quantize, embed_ind, perplexity = euclidean_codebook_forward(x, embed)
    quantize = jax.block_until_ready(quantize)
    embed_ind = jax.block_until_ready(embed_ind)
    perplexity = jax.block_until_ready(perplexity)

    # Sanity-check against a pure-JAX reference.
    q_ref, idx_ref = _reference_forward(x, embed)
    assert quantize.shape == x.shape and quantize.dtype == x.dtype
    assert embed_ind.shape == (batch, seq)
    np.testing.assert_array_equal(np.asarray(embed_ind), np.asarray(idx_ref))
    np.testing.assert_allclose(np.asarray(quantize), np.asarray(q_ref),
                               rtol=1e-5, atol=1e-5)

    print("KERNEL_OK")
</pallas_src>

<mosaic_0001>
module attributes {stable_mosaic.version = 11 : i64} {
  func.func @_vq_kernel(%arg0: i32, %arg1: memref<16x32xf32, #tpu.memory_space<vmem>>, %arg2: memref<128x32xf32, #tpu.memory_space<vmem>>, %arg3: memref<1x128xf32, #tpu.memory_space<vmem>>, %arg4: memref<16x32xf32, #tpu.memory_space<vmem>>, %arg5: memref<1x1x16xi32, #tpu.memory_space<vmem>>) attributes {dimension_semantics = [#tpu.dimension_semantics<parallel>], iteration_bounds = array<i64: 1>, scalar_prefetch = 0 : i64, scratch_operands = 0 : i64, tpu.core_type = #tpu.core_type<tc>, window_params = [{transform_indices = @transform_0, window_bounds = array<i64: 16, 32>}, {pipeline_mode = #tpu.pipeline_mode<synchronous>, transform_indices = @transform_1, window_bounds = array<i64: 128, 32>}, {pipeline_mode = #tpu.pipeline_mode<synchronous>, transform_indices = @transform_2, window_bounds = array<i64: 1, 128>}, {transform_indices = @transform_3, window_bounds = array<i64: 16, 32>}, {transform_indices = @transform_4, window_bounds = array<i64: 1, 1, 16>}]} {
    %c0 = arith.constant 0 : index
    %c0_0 = arith.constant 0 : index
    %0 = vector.load %arg1[%c0, %c0_0] : memref<16x32xf32, #tpu.memory_space<vmem>>, vector<16x32xf32>
    %c0_1 = arith.constant 0 : index
    %c0_2 = arith.constant 0 : index
    %1 = vector.load %arg2[%c0_1, %c0_2] : memref<128x32xf32, #tpu.memory_space<vmem>>, vector<128x32xf32>
    %cst = arith.constant dense<0.000000e+00> : vector<16x128xf32>
    %2 = tpu.matmul %0, %1, %cst {dimension_numbers = #tpu.dot_dimension_numbers<[1], [1], [0], [0], [0, 0, 1, 0], [], []>} : vector<16x32xf32>, vector<128x32xf32>, vector<16x128xf32> -> vector<16x128xf32>
    %c0_3 = arith.constant 0 : index
    %c0_4 = arith.constant 0 : index
    %3 = vector.load %arg3[%c0_3, %c0_4] : memref<1x128xf32, #tpu.memory_space<vmem>>, vector<1x128xf32>
    %4 = vector.broadcast %3 : vector<1x128xf32> to vector<16x128xf32>
    %5 = arith.subf %2, %4 : vector<16x128xf32>
    %6 = tpu.reduce_index %5 {axis = 1 : i32, kind = #tpu.reduction_kind<arg_max>} : vector<16x128xf32> -> vector<16xi32>
    %7 = tpu.iota {dimensions = array<i32: 1>} : vector<16x128xi32>
    %8 = vector.shape_cast %6 : vector<16xi32> to vector<16x1xi32>
    %9 = vector.broadcast %8 : vector<16x1xi32> to vector<16x128xi32>
    %10 = arith.cmpi eq, %7, %9 : vector<16x128xi32>
    %11 = arith.extui %10 : vector<16x128xi1> to vector<16x128xi32>
    %12 = arith.sitofp %11 : vector<16x128xi32> to vector<16x128xf32>
    %cst_5 = arith.constant dense<0.000000e+00> : vector<16x32xf32>
    %13 = tpu.matmul %12, %1, %cst_5 {dimension_numbers = #tpu.dot_dimension_numbers<[1], [0], [0], [1], [0, 0, 1, 1], [], []>} : vector<16x128xf32>, vector<128x32xf32>, vector<16x32xf32> -> vector<16x32xf32>
    %c0_6 = arith.constant 0 : index
    %c0_7 = arith.constant 0 : index
    %14 = vector.load %arg4[%c0_6, %c0_7] : memref<16x32xf32, #tpu.memory_space<vmem>>, vector<16x32xf32>
    tpu.vector_store %arg4[%c0_6, %c0_7], %13 {strides = array<i32>} : memref<16x32xf32, #tpu.memory_space<vmem>>, vector<16x32xf32>,
    %15 = vector.shape_cast %6 : vector<16xi32> to vector<1x1x16xi32>
    %c0_8 = arith.constant 0 : index
    %c0_9 = arith.constant 0 : index
    %c0_10 = arith.constant 0 : index
    %16 = vector.load %arg5[%c0_8, %c0_9, %c0_10] : memref<1x1x16xi32, #tpu.memory_space<vmem>>, vector<1x1x16xi32>
    tpu.vector_store %arg5[%c0_8, %c0_9, %c0_10], %15 {strides = array<i32>} : memref<1x1x16xi32, #tpu.memory_space<vmem>>, vector<1x1x16xi32>,
    return
  }
  func.func @transform_0(%arg0: i32) -> (i32, i32) {
    %c0_i32 = arith.constant 0 : i32
    %c0_i32_0 = arith.constant 0 : i32
    return %arg0, %c0_i32 : i32, i32
  }
  func.func @transform_1(%arg0: i32) -> (i32, i32) {
    %c0_i32 = arith.constant 0 : i32
    %c0_i32_0 = arith.constant 0 : i32
    %c0_i32_1 = arith.constant 0 : i32
    return %c0_i32, %c0_i32_0 : i32, i32
  }
  func.func @transform_2(%arg0: i32) -> (i32, i32) {
    %c0_i32 = arith.constant 0 : i32
    %c0_i32_0 = arith.constant 0 : i32
    %c0_i32_1 = arith.constant 0 : i32
    return %c0_i32, %c0_i32_0 : i32, i32
  }
  func.func @transform_3(%arg0: i32) -> (i32, i32) {
    %c0_i32 = arith.constant 0 : i32
    %c0_i32_0 = arith.constant 0 : i32
    return %arg0, %c0_i32 : i32, i32
  }
  func.func @transform_4(%arg0: i32) -> (i32, i32, i32) {
    %c0_i32 = arith.constant 0 : i32
    %c0_i32_0 = arith.constant 0 : i32
    %c0_i32_1 = arith.constant 0 : i32
    return %arg0, %c0_i32, %c0_i32_0 : i32, i32, i32
  }
}

</mosaic_0001>

<bundles_post_ra>
// kernel: tpu_custom_call.1
= control target key start
LH: loop header
LB: loop body
LE: loop exit
PB: predicated region body
PF: predicated region fallthrough
CT: control target
= control target key end

     0   :  { %10 = vsyncpa [#allocation3], 0  ;;  %vm36_vm0 = vcmask 261120   ;;  %s722_s0 = inlined_call_operand.vmem [shape: f32[16,32], index: 0, kind: input, shape index: {}]   ;;  %s723_s1 = inlined_call_operand.vmem [shape: f32[128,32], index: 1, kind: input, shape index: {}]   ;;  %s724_s2 = inlined_call_operand.vmem [shape: f32[1,128], index: 2, kind: input, shape index: {}]   ;;  %s725_s3 = inlined_call_operand.hbm [shape: f32[16,32], index: 3, kind: output, shape index: {0}]   ;;  %s726_s4 = inlined_call_operand.hbm [shape: s32[1,1,16], index: 4, kind: output, shape index: {1}]  }
   0x1   :  { %v20_v0 = vld [vmem:[%s723_s1] sm:$0xff]  ;;  %v21_v1 = vld [vmem:[%s723_s1 + $0x8] sm:$0xff]  ;;  %v22_v2 = vld [vmem:[%s723_s1 + $0x10] sm:$0xff] }
   0x2   :  { %v436_v3 = vpack.c.bf16 %v21_v1, %v20_v0  ;;  %vm610_vm1 = vmpackc.low %vm36_vm0, %vm36_vm0  ;;  %v23_v5 = vld [vmem:[%s723_s1 + $0x18] sm:$0xff]  ;;  %v24_v7 = vld [vmem:[%s723_s1 + $0x20] sm:$0xff] }
   0x3   :  { %v442_v6 = vpack.c.bf16 %v23_v5, %v22_v2  ;;  %v25_v8 = vld [vmem:[%s723_s1 + $0x28] sm:$0xff]  ;;  %v18_v9 = vld [vmem:[%s722_s0] sm:$0xff] }
   0x4   :  { %438 = vmatprep.subr.msk.bf16.mxu0 %vm610_vm1, %v436_v3  ;;  %485 = vmatprep.subr.bf16.mxu1 %v436_v3 }
   0x5   :  { %441 = vmatpush3.bf16.xpose.msk.msra.mxu0 %vm610_vm1, %v436_v3  ;;  %487 = vmatpush3.bf16.msra.mxu1 %v436_v3 }
   0x6   :  { %444 = vmatprep.subr.msk.bf16.mxu0 %vm610_vm1, %v442_v6  ;;  %489 = vmatprep.subr.bf16.mxu1 %v442_v6 }
   0x7   :  { %398 = vmatprep.mubr.msk.f32.mxu0 %vm36_vm0, %v18_v9 }
   0x8   :  { %11 = vsyncpa [#allocation5], 0  ;;  %v448_v10 = vpack.c.bf16 %v25_v8, %v24_v7  ;;  %v26_v11 = vld [vmem:[%s723_s1 + $0x30] sm:$0xff]  ;;  %v27_v12 = vld [vmem:[%s723_s1 + $0x38] sm:$0xff]  ;;  %v179_v32 = vlaneseq  ;;  %v569_v39 = vmov 1.0   ;;  %vm273_vm3 = vcmask 130112  }
   0x9   :  { %491 = vmatpush3.bf16.msra.mxu1 %v442_v6  ;;  %v454_v13 = vpack.c.bf16 %v27_v12, %v26_v11  ;;  %v28_v14 = vld [vmem:[%s723_s1 + $0x40] sm:$0xff]  ;;  %v29_v15 = vld [vmem:[%s723_s1 + $0x48] sm:$0xff]  ;;  %v30_v17 = vld [vmem:[%s723_s1 + $0x50] sm:$0xff]  ;;  %vm275_vm5 = vcmask 122880  }
   0xa   :  { %493 = vmatprep.subr.bf16.mxu1 %v448_v10  ;;  %v460_v16 = vpack.c.bf16 %v29_v15, %v28_v14  ;;  %v31_v18 = vld [vmem:[%s723_s1 + $0x58] sm:$0xff]  ;;  %v32_v20 = vld [vmem:[%s723_s1 + $0x60] sm:$0xff]  ;;  %v33_v21 = vld [vmem:[%s723_s1 + $0x68] sm:$0xff]  ;;  %v180_v33 = vand.u32 127, %v179_v32  ;;  %v265_v34 = vshrl.u32 %v179_v32, 7 }
   0xb   :  { %v466_v19 = vpack.c.bf16 %v31_v18, %v30_v17  ;;  %v472_v22 = vpack.c.bf16 %v33_v21, %v32_v20  ;;  %v34_v23 = vld [vmem:[%s723_s1 + $0x70] sm:$0xff]  ;;  %v35_v24 = vld [vmem:[%s723_s1 + $0x78] sm:$0xff]  ;;  %v19_v26 = vld [vmem:[%s722_s0 + $0x8] sm:$0xff]  ;;  %s570_s0 = smov [#allocation4]  }
   0xc   :  { %v478_v25 = vpack.c.bf16 %v35_v24, %v34_v23  ;;  %v325_v27 = vld [vmem:[%s724_s2] ss:$0 sm:$0xff]  ;;  %v268_v35 = vadd.s32 4294967288, %v180_v33  ;;  %v266_v37 = vsub.s32 %v180_v33, %v265_v34  ;;  %s295_s2 = sshll.u32 %s570_s0, 4  ;;  %s296_s2 = int_to_ptr.vmem [resolvable:$true] %s295_s2 }
   0xd   :  { %447 = vmatpush3.bf16.xpose.msk.msra.mxu0 %vm610_vm1, %v442_v6  ;;  %495 = vmatpush3.bf16.msra.mxu1 %v448_v10  ;;  %s521_s26 = scalar_lea.vmem %s296_s2, 16  ;;  %s525_s27 = scalar_lea.vmem %s296_s2, 32 }
   0xe   :  { %450 = vmatprep.subr.msk.bf16.mxu0 %vm610_vm1, %v448_v10  ;;  %497 = vmatprep.subr.bf16.mxu1 %v454_v13  ;;  %v271_v38 = vsub.s32 %v268_v35, %v265_v34  ;;  %p522_p0 = scmp.ne.s32.totalorder %s296_s2, %s521_s26  ;;  %p526_p1 = scmp.lt.s32.totalorder %s296_s2, %s296_s2 }
   0xf   :  { %p527_p2 = scmp.lt.s32.totalorder %s525_s27, %s521_s26 }
  0x11   :  { %499 = vmatpush3.bf16.msra.mxu1 %v454_v13  ;;  %p528_p3 = por %p527_p2, %p526_p1 }
  0x12   :  { %501 = vmatprep.subr.bf16.mxu1 %v460_v16 }
  0x13   :  { %p529_p4 = pnand %p528_p3, %p522_p0 }
  0x15   :  { %453 = vmatpush3.bf16.xpose.msk.msra.mxu0 %vm610_vm1, %v448_v10  ;;  %503 = vmatpush3.bf16.msra.mxu1 %v460_v16 }
  0x16   :  { %456 = vmatprep.subr.msk.bf16.mxu0 %vm610_vm1, %v454_v13  ;;  %505 = vmatprep.subr.bf16.mxu1 %v466_v19 }
  0x19   :  { %507 = vmatpush3.bf16.msra.mxu1 %v466_v19 }
  0x1a   :  { %509 = vmatprep.subr.bf16.mxu1 %v472_v22 }
  0x1d   :  { %459 = vmatpush3.bf16.xpose.msk.msra.mxu0 %vm610_vm1, %v454_v13  ;;  %511 = vmatpush3.bf16.msra.mxu1 %v472_v22 }
  0x1e   :  { %462 = vmatprep.subr.msk.bf16.mxu0 %vm610_vm1, %v460_v16  ;;  %513 = vmatprep.subr.bf16.mxu1 %v478_v25 }
  0x21   :  { %515 = vmatpush3.bf16.msra.mxu1 %v478_v25 }
  0x25   :  { %465 = vmatpush3.bf16.xpose.msk.msra.mxu0 %vm610_vm1, %v460_v16 }
  0x26   :  { %468 = vmatprep.subr.msk.bf16.mxu0 %vm610_vm1, %v466_v19 }
  0x2d   :  { %471 = vmatpush3.bf16.xpose.msk.msra.mxu0 %vm610_vm1, %v466_v19 }
  0x2e   :  { %474 = vmatprep.subr.msk.bf16.mxu0 %vm610_vm1, %v472_v22 }
  0x35   :  { %477 = vmatpush3.bf16.xpose.msk.msra.mxu0 %vm610_vm1, %v472_v22 }
  0x36   :  { %480 = vmatprep.subr.msk.bf16.mxu0 %vm610_vm1, %v478_v25 }
  0x3d   :  { %483 = vmatpush3.bf16.xpose.msk.msra.mxu0 %vm610_vm1, %v478_v25 }
  0x44   :  { %399 = vmatmul.mubr.msk.f32.vlgmr.msra.gmra.mrb[0].mxu0 %vm36_vm0, %v19_v26 }
 0x117   :  { %v400_v28 = vpop.f32.mrb[0].mxu0 }
 0x118   :  { %v157_v29 = vpop.f32.mrb[1].mxu0  ;;  %v174_v31 = vsub.f32 %v400_v28, %v325_v27 }
 0x119   :  { %v173_v30 = vsub.f32 %v157_v29, %v325_v27 }
 0x11b   :  { %175 = vmax.index.xlane.f32.xlu0 %v173_v30 }
 0x11f   :  { %177 = vmax.index.xlane.f32.xlu0 %v174_v31 }
 0x1a8   :  { %v176_v36 = vpop.xlane.xlu0 %175 }
 0x1a9   :  { %vm181_vm2 = vcmp.eq.s32.totalorder %v180_v33, %v176_v36  ;;  %v267_v41 = vrot.slane %v176_v36, %v266_v37 }
 0x1aa   :  { %433 = vmatprep.mubr.msk.f32.mxu1 %vm181_vm2, %v569_v39 }
 0x1ac   :  { %v178_v40 = vpop.xlane.xlu0 %177 }
 0x1ad   :  { %vm182_vm4 = vcmp.eq.s32.totalorder %v180_v33, %v178_v40  ;;  %v272_v42 = vrot.slane %v178_v40, %v271_v38 }
 0x1ae   :  { %434 = vmatmul.mubr.msk.f32.vlgmr.msra.gmra.mrb[0].mxu1 %vm182_vm4, %v569_v39 }
 0x1af   :  { %v274_v43 = vsel %vm273_vm3, %v272_v42, %v267_v41 }
 0x1b0   :  { %276 = vst.msk [vmem:[#allocation4] sm:$0x1] %vm275_vm5, %v274_v43 }
 0x1b1   :  { %532 = shalt.err (!%p529_p4)
}
 0x1b2   :  { %s533_s30 = scalar_lea.hbm %s726_s4, 16 }
 0x1b3   :  { %p534_p5 = scmp.ne.s32.totalorder %s726_s4, %s533_s30  ;;  %p537_p6 = scmp.lt.u32.totalorder %s533_s30, %s726_s4 }
 0x1b5   :  { %p539_p7 = pnand %p537_p6, %p534_p5 }
 0x1b7   :  { %542 = shalt.err (!%p539_p7)
}
 0x1b8   :  { %298 = dma.vmem_to_hbm [thread:$0]  %s296_s2, 16, %s726_s4, [#allocation5]  }
 0x1b9   :  { %s571_s11 = smov [#allocation2]  }
 0x1ba   :  { %s282_s12 = sshll.u32 %s571_s11, 4  ;;  %s283_s12 = int_to_ptr.vmem [resolvable:$true] %s282_s12 }
 0x1bb   :  { %s543_s13 = scalar_lea.vmem %s283_s12, 256  ;;  %p548_p9 = scmp.lt.s32.totalorder %s283_s12, %s283_s12 }
 0x1bc   :  { %p544_p8 = scmp.ne.s32.totalorder %s283_s12, %s543_s13  ;;  %p549_p10 = scmp.lt.s32.totalorder %s543_s13, %s543_s13 }
 0x1be   :  { %p550_p11 = por %p549_p10, %p548_p9 }
 0x1c0   :  { %p551_p12 = pnand %p550_p11, %p544_p8 }
 0x281   :  { %v435_v44 = vpop.f32.mrb[0].mxu1 }
 0x282   :  { %263 = vst.msk [vmem:[#allocation2 + $0x8] sm:$0xff] %vm36_vm0, %v435_v44  ;;  %v253_v45 = vpop.f32.mrb[1].mxu1 }
 0x283   :  { %262 = vst.msk [vmem:[#allocation2] sm:$0xff] %vm36_vm0, %v253_v45 }
 0x284   :  { %554 = shalt.err (!%p551_p12)
}
 0x285   :  { %s555_s4 = scalar_lea.hbm %s725_s3, 256 }
 0x286   :  { %p556_p13 = scmp.ne.s32.totalorder %s725_s3, %s555_s4  ;;  %p559_p0 = scmp.lt.u32.totalorder %s555_s4, %s725_s3 }
 0x288   :  { %p561_p1 = pnand %p559_p0, %p556_p13 }
 0x28a   :  { %564 = shalt.err (!%p561_p1)
}
 0x28b   :  { %s572_s20 = smov 128   ;;  %s573_s21 = smov 8  }
 0x28c   :  { %288 = dma.vmem_to_hbm [thread:$0]  %s283_s12, 256, %s725_s3, [#allocation3], %s572_s20, %s572_s20, %s573_s21  }
 0x28d   :  { %565 = dma.done.wait [#allocation3], 256  }
 0x28e   :  { %566 = vsyncadd [#allocation3], 4294967040 }
 0x28f   :  { %567 = dma.done.wait [#allocation5], 16  }
 0x290   :  { %568 = vsyncadd [#allocation5], 4294967280 }
 0x291   :  { %305 = vsyncpa [#allocation3], 1 }
 0x292   :  { %306 = vsyncpa [#allocation5], 1 }

</bundles_post_ra>
